<compile_context>
chip_gen: v5e
topology: v5e:2x2
jax: 0.10.0
libtpu: 0.0.40
codegen_flags: <defaults>
</compile_context>

<pallas_src>
import functools

import jax
import jax.numpy as jnp
from jax.experimental import pallas as pl
from jax.experimental.pallas import tpu as pltpu

_LANES = 128
_SUBLANES = 8
# 2048 rows x 128 lanes (f32) = 1 MiB per pipeline buffer; 2 inputs x 2
# buffers = 4 MiB, safe on all generations' default scoped VMEM.
_MAX_BLOCK_ROWS = 2048


def _pick_chunk_rows(block_rows):
    """Largest of {64,32,16,8} dividing block_rows (block_rows % 8 == 0)."""
    for c in (64, 32, 16, 8):
        if block_rows % c == 0:
            return c
    return block_rows  # unreachable: block_rows is always a multiple of 8


def _qbmse_kernel(num_q, block_rows, chunk_rows, blocks_per_split,
                  rows_full, rem_lanes,
                  thr_ref, pred_ref, tgt_ref, out_ref):
    c = pl.program_id(0)   # core-half index ("parallel")
    j = pl.program_id(1)   # streaming block index within the half ("arbitrary")

    @pl.when(j == 0)
    def _init():
        out_ref[...] = jnp.zeros_like(out_ref)

    # Intended (unclamped) global starting row of this block.  The input
    # index_map clamps duplicate trailing blocks of the last core-half; their
    # rows fall beyond `rows_full` and are masked out below.
    base_row = (c * blocks_per_split + j) * block_rows

    # ---- loop-invariant pieces, hoisted out of the chunk loop -------------
    thrs = [thr_ref[q] for q in range(1, num_q + 1)]   # SMEM scalar reads
    row_iota = jax.lax.broadcasted_iota(jnp.int32, (chunk_rows, _LANES), 0)
    lane_iota = jax.lax.broadcasted_iota(jnp.int32, (chunk_rows, _LANES), 1)
    # Element (row, lane) is valid iff row < rows_full, or
    # row == rows_full and lane < rem_lanes  <=>  row <= row_limit(lane).
    row_limit = (jnp.where(lane_iota < rem_lanes, rows_full, rows_full - 1)
                 - base_row)

    num_chunks = block_rows // chunk_rows
    groups = chunk_rows // _SUBLANES
    zero = jnp.float32(0.0)
    one = jnp.float32(1.0)
    neg_inf = jnp.float32(-jnp.inf)

    def vsum(x):
        # (chunk_rows,128) -> (8,128): pure vreg+vreg VPU adds, no cross-lane.
        return jnp.sum(x.reshape(groups, _SUBLANES, _LANES), axis=0)

    def chunk_body(ck, carry):
        sums = carry[:num_q + 1]   # S_0..S_K partials, each (8,128)
        cnts = carry[num_q + 1:]   # C_1..C_K partials, each (8,128)

        off = pl.multiple_of(ck * chunk_rows, chunk_rows)
        p = pred_ref[pl.ds(off, chunk_rows), :].astype(jnp.float32)
        t = tgt_ref[pl.ds(off, chunk_rows), :].astype(jnp.float32)
        d = p - t
        sq = d * d

        valid = (row_iota + off) <= row_limit
        sq = jnp.where(valid, sq, zero)      # also kills NaN/Inf tail garbage
        t = jnp.where(valid, t, neg_inf)     # invalid lanes never pass t>=thr

        # q = 0: every valid element satisfies t >= min(t)  ->  plain reduce.
        new_sums = [sums[0] + vsum(sq)]
        new_cnts = []
        for q in range(num_q):
            ge = t >= thrs[q]
            new_sums.append(sums[q + 1] + vsum(jnp.where(ge, sq, zero)))
            new_cnts.append(cnts[q] + vsum(jnp.where(ge, one, zero)))
        return tuple(new_sums) + tuple(new_cnts)

    init = tuple(jnp.zeros((_SUBLANES, _LANES), jnp.float32)
                 for _ in range(2 * num_q + 1))
    acc = jax.lax.fori_loop(0, num_chunks, chunk_body, init,
                            unroll=2 if num_chunks > 1 else 1)

    # Fold the vreg-resident chunk partials into the resident output block
    # (11 vreg load/add/store per grid step — negligible).
    for idx in range(2 * num_q + 1):
        out_ref[0, idx] = out_ref[0, idx] + acc[idx]


def quantile_balanced_mse_loss(predictions, targets, num_quantiles: int = 5,
                               quantile_weights=None):
    assert predictions.shape == targets.shape
    K = num_quantiles
    if quantile_weights is None:
        weights = jnp.full((K,), 1.0 / K, jnp.float32)
    else:
        weights = jnp.asarray(quantile_weights, dtype=jnp.float32)

    p = predictions.reshape(-1)
    t = targets.reshape(-1)
    n = int(p.shape[0])

    # Quantile thresholds over the flattened targets (torch.quantile default
    # 'linear' interpolation == jnp.quantile default).
    # TODO(synk): this exact quantile needs a full device sort (O(n log n));
    # for very large tensors it — not the O(n) fused kernel — dominates the
    # end-to-end time; a streaming-histogram estimate would change semantics.
    levels = jnp.linspace(0.0, 1.0, K + 1)
    thresholds = jnp.quantile(t.astype(jnp.float32), levels).astype(jnp.float32)

    # View the flat vector as (rows, 128); pad only to a whole number of
    # (8,128) vregs.  Padded / out-of-bounds elements are masked in-kernel.
    vreg = _SUBLANES * _LANES
    n_pad = pl.cdiv(n, vreg) * vreg
    if n_pad != n:
        pad = n_pad - n
        p = jnp.pad(p, (0, pad))
        t = jnp.pad(t, (0, pad))
    rows = n_pad // _LANES

    block_rows = min(rows, _MAX_BLOCK_ROWS)
    chunk_rows = _pick_chunk_rows(block_rows)
    total_blocks = pl.cdiv(rows, block_rows)
    splits = 2 if total_blocks >= 2 else 1          # 2-TC split on v7x
    blocks_per_split = pl.cdiv(total_blocks, splits)

    rows_full = n // _LANES    # number of completely valid rows
    rem_lanes = n % _LANES     # valid lanes in row `rows_full`

    p2 = p.reshape(rows, _LANES)
    t2 = t.reshape(rows, _LANES)

    def tensor_index_map(c, j):
        # Clamp: an over-provisioned last core-half re-reads the final block;
        # its contribution is fully masked out inside the kernel.
        return (jnp.minimum(c * blocks_per_split + j, total_blocks - 1), 0)

    kernel = functools.partial(_qbmse_kernel, K, block_rows, chunk_rows,
                               blocks_per_split, rows_full, rem_lanes)

    acc = pl.pallas_call(
        kernel,
        out_shape=jax.ShapeDtypeStruct(
            (splits, 2 * K + 1, _SUBLANES, _LANES), jnp.float32),
        grid=(splits, blocks_per_split),
        in_specs=[
            # Threshold table lives in SMEM (scalar path, no per-step DMA).
            pl.BlockSpec(memory_space=pltpu.MemorySpace.SMEM),        # thresholds
            pl.BlockSpec((block_rows, _LANES), tensor_index_map),     # predictions
            pl.BlockSpec((block_rows, _LANES), tensor_index_map),     # targets
        ],
        out_specs=pl.BlockSpec((1, 2 * K + 1, _SUBLANES, _LANES),
                               lambda c, j: (c, 0, 0, 0)),
        compiler_params=pltpu.CompilerParams(
            dimension_semantics=("parallel", "arbitrary")),
    )(thresholds, p2, t2)

    # Tiny epilogue in plain JAX: cross-lane reduce, cumulative differencing,
    # weighted combine.
    totals = jnp.sum(acc, axis=(0, 2, 3))           # (2K+1,)
    S = totals[:K + 1]                              # S_q for thresholds 0..K
    C = jnp.concatenate([jnp.full((1,), float(n), jnp.float32),
                         totals[K + 1:]])           # C_0 = n (t >= min always)
    bucket_s = S[:K] - S[1:]
    bucket_c = C[:K] - C[1:]
    loss = jnp.sum(jnp.where(bucket_c > 0,
                             weights * bucket_s / jnp.maximum(bucket_c, 1.0),
                             jnp.float32(0.0)))
    return loss


def _reference_loss(predictions, targets, num_quantiles: int = 5,
                    quantile_weights=None):
    """Pure-JAX replica of the PyTorch QuantileBalancedMSELoss forward."""
    p = predictions.astype(jnp.float32).reshape(-1)
    t = targets.astype(jnp.float32).reshape(-1)
    if quantile_weights is None:
        w = jnp.full((num_quantiles,), 1.0 / num_quantiles, jnp.float32)
    else:
        w = jnp.asarray(quantile_weights, dtype=jnp.float32)
    qs = jnp.quantile(t, jnp.linspace(0.0, 1.0, num_quantiles + 1))
    sq = (p - t) ** 2
    total = jnp.float32(0.0)
    for i in range(num_quantiles):
        m = (t >= qs[i]) & (t < qs[i + 1])
        cnt = jnp.sum(m.astype(jnp.float32))
        s = jnp.sum(jnp.where(m, sq, 0.0))
        total = total + jnp.where(cnt > 0, w[i] * s / jnp.maximum(cnt, 1.0),
                                  0.0)
    return total


if __name__ == "__main__":
    key = jax.random.PRNGKey(0)
    k1, k2 = jax.random.split(key)

    # NCHW-like regression map, as the module applies to arbitrary tensors.
    shape = (2, 4, 16, 16)
    predictions = jax.random.normal(k1, shape, dtype=jnp.float32)
    targets = jax.random.normal(k2, shape, dtype=jnp.float32)

    loss = quantile_balanced_mse_loss(predictions, targets, num_quantiles=5)
    loss = jax.block_until_ready(loss)

    ref = jax.block_until_ready(_reference_loss(predictions, targets, 5))
    assert jnp.allclose(loss, ref, rtol=5e-4, atol=1e-5), (loss, ref)

    print("KERNEL_OK")
</pallas_src>

<mosaic_0001>
module attributes {stable_mosaic.version = 11 : i64} {
  func.func @_qbmse_kernel(%arg0: i32, %arg1: i32, %arg2: memref<6xf32, #tpu.memory_space<smem>>, %arg3: memref<16x128xf32, #tpu.memory_space<vmem>>, %arg4: memref<16x128xf32, #tpu.memory_space<vmem>>, %arg5: memref<1x11x8x128xf32, #tpu.memory_space<vmem>>) attributes {dimension_semantics = [#tpu.dimension_semantics<parallel>, #tpu.dimension_semantics<arbitrary>], iteration_bounds = array<i64: 1, 1>, scalar_prefetch = 0 : i64, scratch_operands = 0 : i64, tpu.core_type = #tpu.core_type<tc>, window_params = [{transform_indices = @transform_0, window_bounds = array<i64: 6>}, {transform_indices = @transform_1, window_bounds = array<i64: 16, 128>}, {transform_indices = @transform_2, window_bounds = array<i64: 16, 128>}, {transform_indices = @transform_3, window_bounds = array<i64: 1, 11, 8, 128>}]} {
    %c0_i32 = arith.constant 0 : i32
    %0 = arith.cmpi eq, %arg1, %c0_i32 : i32
    %1 = arith.extui %0 : i1 to i32
    %c0_i32_0 = arith.constant 0 : i32
    %2 = arith.cmpi ne, %1, %c0_i32_0 : i32
    scf.if %2 {
      %cst_114 = arith.constant 0.000000e+00 : f32
      %180 = vector.broadcast %cst_114 : f32 to vector<1x11x8x128xf32>
      %c0_115 = arith.constant 0 : index
      %c0_116 = arith.constant 0 : index
      %c0_117 = arith.constant 0 : index
      %c0_118 = arith.constant 0 : index
      %181 = vector.load %arg5[%c0_115, %c0_116, %c0_117, %c0_118] : memref<1x11x8x128xf32, #tpu.memory_space<vmem>>, vector<1x11x8x128xf32>
      tpu.vector_store %arg5[%c0_115, %c0_116, %c0_117, %c0_118], %180 {strides = array<i32>} : memref<1x11x8x128xf32, #tpu.memory_space<vmem>>, vector<1x11x8x128xf32>,
    } else {
    }
    %c1_i32 = arith.constant 1 : i32
    %3 = arith.muli %arg0, %c1_i32 : i32
    %4 = arith.addi %3, %arg1 : i32
    %c16_i32 = arith.constant 16 : i32
    %5 = arith.muli %4, %c16_i32 : i32
    %c1 = arith.constant 1 : index
    %6 = memref.load %arg2[%c1] : memref<6xf32, #tpu.memory_space<smem>>
    %c2 = arith.constant 2 : index
    %7 = memref.load %arg2[%c2] : memref<6xf32, #tpu.memory_space<smem>>
    %c3 = arith.constant 3 : index
    %8 = memref.load %arg2[%c3] : memref<6xf32, #tpu.memory_space<smem>>
    %c4 = arith.constant 4 : index
    %9 = memref.load %arg2[%c4] : memref<6xf32, #tpu.memory_space<smem>>
    %c5 = arith.constant 5 : index
    %10 = memref.load %arg2[%c5] : memref<6xf32, #tpu.memory_space<smem>>
    %11 = tpu.iota {dimensions = array<i32: 0>} : vector<16x128xi32>
    %12 = tpu.iota {dimensions = array<i32: 1>} : vector<16x128xi32>
    %c0_i32_1 = arith.constant 0 : i32
    %13 = vector.broadcast %c0_i32_1 : i32 to vector<16x128xi32>
    %14 = arith.cmpi slt, %12, %13 : vector<16x128xi32>
    %c16_i32_2 = arith.constant 16 : i32
    %c15_i32 = arith.constant 15 : i32
    %15 = vector.broadcast %c16_i32_2 : i32 to vector<16x128xi32>
    %16 = vector.broadcast %c15_i32 : i32 to vector<16x128xi32>
    %17 = arith.select %14, %15, %16 : vector<16x128xi1>, vector<16x128xi32>
    %18 = vector.broadcast %5 : i32 to vector<16x128xi32>
    %19 = arith.subi %17, %18 : vector<16x128xi32>
    %cst = arith.constant 0.000000e+00 : f32
    %20 = vector.broadcast %cst : f32 to vector<8x128xf32>
    %cst_3 = arith.constant 0.000000e+00 : f32
    %21 = vector.broadcast %cst_3 : f32 to vector<8x128xf32>
    %cst_4 = arith.constant 0.000000e+00 : f32
    %22 = vector.broadcast %cst_4 : f32 to vector<8x128xf32>
    %cst_5 = arith.constant 0.000000e+00 : f32
    %23 = vector.broadcast %cst_5 : f32 to vector<8x128xf32>
    %cst_6 = arith.constant 0.000000e+00 : f32
    %24 = vector.broadcast %cst_6 : f32 to vector<8x128xf32>
    %cst_7 = arith.constant 0.000000e+00 : f32
    %25 = vector.broadcast %cst_7 : f32 to vector<8x128xf32>
    %cst_8 = arith.constant 0.000000e+00 : f32
    %26 = vector.broadcast %cst_8 : f32 to vector<8x128xf32>
    %cst_9 = arith.constant 0.000000e+00 : f32
    %27 = vector.broadcast %cst_9 : f32 to vector<8x128xf32>
    %cst_10 = arith.constant 0.000000e+00 : f32
    %28 = vector.broadcast %cst_10 : f32 to vector<8x128xf32>
    %cst_11 = arith.constant 0.000000e+00 : f32
    %29 = vector.broadcast %cst_11 : f32 to vector<8x128xf32>
    %cst_12 = arith.constant 0.000000e+00 : f32
    %30 = vector.broadcast %cst_12 : f32 to vector<8x128xf32>
    %cst_13 = arith.constant 0.000000e+00 : f32
    %cst_14 = arith.constant 0xFF800000 : f32
    %cst_15 = arith.constant 1.000000e+00 : f32
    %c0_i32_16 = arith.constant 0 : i32
    %c16_i32_17 = arith.constant 16 : i32
    %31 = arith.muli %c0_i32_16, %c16_i32_17 : i32
    %32 = tpu.assume_multiple %31, 16 : i32
    %33 = arith.index_cast %32 : i32 to index
    %c0 = arith.constant 0 : index
    %34 = vector.load %arg3[%33, %c0] : memref<16x128xf32, #tpu.memory_space<vmem>>, vector<16x128xf32>
    %35 = arith.index_cast %32 : i32 to index
    %c0_18 = arith.constant 0 : index
    %36 = vector.load %arg4[%35, %c0_18] : memref<16x128xf32, #tpu.memory_space<vmem>>, vector<16x128xf32>
    %37 = arith.subf %34, %36 : vector<16x128xf32>
    %38 = arith.mulf %37, %37 : vector<16x128xf32>
    %39 = vector.broadcast %32 : i32 to vector<16x128xi32>
    %40 = arith.addi %11, %39 : vector<16x128xi32>
    %41 = arith.cmpi sle, %40, %19 : vector<16x128xi32>
    %42 = vector.broadcast %cst_13 : f32 to vector<16x128xf32>
    %43 = arith.select %41, %38, %42 : vector<16x128xi1>, vector<16x128xf32>
    %44 = vector.broadcast %cst_14 : f32 to vector<16x128xf32>
    %45 = arith.select %41, %36, %44 : vector<16x128xi1>, vector<16x128xf32>
    %46 = vector.shape_cast %43 : vector<16x128xf32> to vector<2x8x128xf32>
    %cst_19 = arith.constant dense<0.000000e+00> : vector<8x128xf32>
    %47 = vector.multi_reduction <add>, %46, %cst_19 [0] : vector<2x8x128xf32> to vector<8x128xf32>
    %48 = arith.addf %20, %47 : vector<8x128xf32>
    %49 = vector.broadcast %6 : f32 to vector<16x128xf32>
    %50 = arith.cmpf oge, %45, %49 : vector<16x128xf32>
    %51 = vector.broadcast %cst_13 : f32 to vector<16x128xf32>
    %52 = arith.select %50, %43, %51 : vector<16x128xi1>, vector<16x128xf32>
    %53 = vector.shape_cast %52 : vector<16x128xf32> to vector<2x8x128xf32>
    %cst_20 = arith.constant dense<0.000000e+00> : vector<8x128xf32>
    %54 = vector.multi_reduction <add>, %53, %cst_20 [0] : vector<2x8x128xf32> to vector<8x128xf32>
    %55 = arith.addf %21, %54 : vector<8x128xf32>
    %56 = vector.broadcast %cst_15 : f32 to vector<16x128xf32>
    %57 = vector.broadcast %cst_13 : f32 to vector<16x128xf32>
    %58 = arith.select %50, %56, %57 : vector<16x128xi1>, vector<16x128xf32>
    %59 = vector.shape_cast %58 : vector<16x128xf32> to vector<2x8x128xf32>
    %cst_21 = arith.constant dense<0.000000e+00> : vector<8x128xf32>
    %60 = vector.multi_reduction <add>, %59, %cst_21 [0] : vector<2x8x128xf32> to vector<8x128xf32>
    %61 = arith.addf %26, %60 : vector<8x128xf32>
    %62 = vector.broadcast %7 : f32 to vector<16x128xf32>
    %63 = arith.cmpf oge, %45, %62 : vector<16x128xf32>
    %64 = vector.broadcast %cst_13 : f32 to vector<16x128xf32>
    %65 = arith.select %63, %43, %64 : vector<16x128xi1>, vector<16x128xf32>
    %66 = vector.shape_cast %65 : vector<16x128xf32> to vector<2x8x128xf32>
    %cst_22 = arith.constant dense<0.000000e+00> : vector<8x128xf32>
    %67 = vector.multi_reduction <add>, %66, %cst_22 [0] : vector<2x8x128xf32> to vector<8x128xf32>
    %68 = arith.addf %22, %67 : vector<8x128xf32>
    %69 = vector.broadcast %cst_15 : f32 to vector<16x128xf32>
    %70 = vector.broadcast %cst_13 : f32 to vector<16x128xf32>
    %71 = arith.select %63, %69, %70 : vector<16x128xi1>, vector<16x128xf32>
    %72 = vector.shape_cast %71 : vector<16x128xf32> to vector<2x8x128xf32>
    %cst_23 = arith.constant dense<0.000000e+00> : vector<8x128xf32>
    %73 = vector.multi_reduction <add>, %72, %cst_23 [0] : vector<2x8x128xf32> to vector<8x128xf32>
    %74 = arith.addf %27, %73 : vector<8x128xf32>
    %75 = vector.broadcast %8 : f32 to vector<16x128xf32>
    %76 = arith.cmpf oge, %45, %75 : vector<16x128xf32>
    %77 = vector.broadcast %cst_13 : f32 to vector<16x128xf32>
    %78 = arith.select %76, %43, %77 : vector<16x128xi1>, vector<16x128xf32>
    %79 = vector.shape_cast %78 : vector<16x128xf32> to vector<2x8x128xf32>
    %cst_24 = arith.constant dense<0.000000e+00> : vector<8x128xf32>
    %80 = vector.multi_reduction <add>, %79, %cst_24 [0] : vector<2x8x128xf32> to vector<8x128xf32>
    %81 = arith.addf %23, %80 : vector<8x128xf32>
    %82 = vector.broadcast %cst_15 : f32 to vector<16x128xf32>
    %83 = vector.broadcast %cst_13 : f32 to vector<16x128xf32>
    %84 = arith.select %76, %82, %83 : vector<16x128xi1>, vector<16x128xf32>
    %85 = vector.shape_cast %84 : vector<16x128xf32> to vector<2x8x128xf32>
    %cst_25 = arith.constant dense<0.000000e+00> : vector<8x128xf32>
    %86 = vector.multi_reduction <add>, %85, %cst_25 [0] : vector<2x8x128xf32> to vector<8x128xf32>
    %87 = arith.addf %28, %86 : vector<8x128xf32>
    %88 = vector.broadcast %9 : f32 to vector<16x128xf32>
    %89 = arith.cmpf oge, %45, %88 : vector<16x128xf32>
    %90 = vector.broadcast %cst_13 : f32 to vector<16x128xf32>
    %91 = arith.select %89, %43, %90 : vector<16x128xi1>, vector<16x128xf32>
    %92 = vector.shape_cast %91 : vector<16x128xf32> to vector<2x8x128xf32>
    %cst_26 = arith.constant dense<0.000000e+00> : vector<8x128xf32>
    %93 = vector.multi_reduction <add>, %92, %cst_26 [0] : vector<2x8x128xf32> to vector<8x128xf32>
    %94 = arith.addf %24, %93 : vector<8x128xf32>
    %95 = vector.broadcast %cst_15 : f32 to vector<16x128xf32>
    %96 = vector.broadcast %cst_13 : f32 to vector<16x128xf32>
    %97 = arith.select %89, %95, %96 : vector<16x128xi1>, vector<16x128xf32>
    %98 = vector.shape_cast %97 : vector<16x128xf32> to vector<2x8x128xf32>
    %cst_27 = arith.constant dense<0.000000e+00> : vector<8x128xf32>
    %99 = vector.multi_reduction <add>, %98, %cst_27 [0] : vector<2x8x128xf32> to vector<8x128xf32>
    %100 = arith.addf %29, %99 : vector<8x128xf32>
    %101 = vector.broadcast %10 : f32 to vector<16x128xf32>
    %102 = arith.cmpf oge, %45, %101 : vector<16x128xf32>
    %103 = vector.broadcast %cst_13 : f32 to vector<16x128xf32>
    %104 = arith.select %102, %43, %103 : vector<16x128xi1>, vector<16x128xf32>
    %105 = vector.shape_cast %104 : vector<16x128xf32> to vector<2x8x128xf32>
    %cst_28 = arith.constant dense<0.000000e+00> : vector<8x128xf32>
    %106 = vector.multi_reduction <add>, %105, %cst_28 [0] : vector<2x8x128xf32> to vector<8x128xf32>
    %107 = arith.addf %25, %106 : vector<8x128xf32>
    %108 = vector.broadcast %cst_15 : f32 to vector<16x128xf32>
    %109 = vector.broadcast %cst_13 : f32 to vector<16x128xf32>
    %110 = arith.select %102, %108, %109 : vector<16x128xi1>, vector<16x128xf32>
    %111 = vector.shape_cast %110 : vector<16x128xf32> to vector<2x8x128xf32>
    %cst_29 = arith.constant dense<0.000000e+00> : vector<8x128xf32>
    %112 = vector.multi_reduction <add>, %111, %cst_29 [0] : vector<2x8x128xf32> to vector<8x128xf32>
    %113 = arith.addf %30, %112 : vector<8x128xf32>
    %c1_i32_30 = arith.constant 1 : i32
    %c0_31 = arith.constant 0 : index
    %c0_32 = arith.constant 0 : index
    %c0_33 = arith.constant 0 : index
    %c0_34 = arith.constant 0 : index
    %114 = vector.load %arg5[%c0_31, %c0_32, %c0_33, %c0_34] : memref<1x11x8x128xf32, #tpu.memory_space<vmem>>, vector<1x1x8x128xf32>
    %115 = vector.shape_cast %114 : vector<1x1x8x128xf32> to vector<8x128xf32>
    %116 = arith.addf %115, %48 : vector<8x128xf32>
    %c0_35 = arith.constant 0 : index
    %c0_36 = arith.constant 0 : index
    %c0_37 = arith.constant 0 : index
    %c0_38 = arith.constant 0 : index
    %117 = vector.load %arg5[%c0_35, %c0_36, %c0_37, %c0_38] : memref<1x11x8x128xf32, #tpu.memory_space<vmem>>, vector<1x1x8x128xf32>
    %118 = vector.shape_cast %117 : vector<1x1x8x128xf32> to vector<8x128xf32>
    %119 = vector.shape_cast %116 : vector<8x128xf32> to vector<1x1x8x128xf32>
    tpu.vector_store %arg5[%c0_35, %c0_36, %c0_37, %c0_38], %119 {strides = array<i32>} : memref<1x11x8x128xf32, #tpu.memory_space<vmem>>, vector<1x1x8x128xf32>,
    %c0_39 = arith.constant 0 : index
    %c1_40 = arith.constant 1 : index
    %c0_41 = arith.constant 0 : index
    %c0_42 = arith.constant 0 : index
    %120 = vector.load %arg5[%c0_39, %c1_40, %c0_41, %c0_42] : memref<1x11x8x128xf32, #tpu.memory_space<vmem>>, vector<1x1x8x128xf32>
    %121 = vector.shape_cast %120 : vector<1x1x8x128xf32> to vector<8x128xf32>
    %122 = arith.addf %121, %55 : vector<8x128xf32>
    %c0_43 = arith.constant 0 : index
    %c1_44 = arith.constant 1 : index
    %c0_45 = arith.constant 0 : index
    %c0_46 = arith.constant 0 : index
    %123 = vector.load %arg5[%c0_43, %c1_44, %c0_45, %c0_46] : memref<1x11x8x128xf32, #tpu.memory_space<vmem>>, vector<1x1x8x128xf32>
    %124 = vector.shape_cast %123 : vector<1x1x8x128xf32> to vector<8x128xf32>
    %125 = vector.shape_cast %122 : vector<8x128xf32> to vector<1x1x8x128xf32>
    tpu.vector_store %arg5[%c0_43, %c1_44, %c0_45, %c0_46], %125 {strides = array<i32>} : memref<1x11x8x128xf32, #tpu.memory_space<vmem>>, vector<1x1x8x128xf32>,
    %c0_47 = arith.constant 0 : index
    %c2_48 = arith.constant 2 : index
    %c0_49 = arith.constant 0 : index
    %c0_50 = arith.constant 0 : index
    %126 = vector.load %arg5[%c0_47, %c2_48, %c0_49, %c0_50] : memref<1x11x8x128xf32, #tpu.memory_space<vmem>>, vector<1x1x8x128xf32>
    %127 = vector.shape_cast %126 : vector<1x1x8x128xf32> to vector<8x128xf32>
    %128 = arith.addf %127, %68 : vector<8x128xf32>
    %c0_51 = arith.constant 0 : index
    %c2_52 = arith.constant 2 : index
    %c0_53 = arith.constant 0 : index
    %c0_54 = arith.constant 0 : index
    %129 = vector.load %arg5[%c0_51, %c2_52, %c0_53, %c0_54] : memref<1x11x8x128xf32, #tpu.memory_space<vmem>>, vector<1x1x8x128xf32>
    %130 = vector.shape_cast %129 : vector<1x1x8x128xf32> to vector<8x128xf32>
    %131 = vector.shape_cast %128 : vector<8x128xf32> to vector<1x1x8x128xf32>
    tpu.vector_store %arg5[%c0_51, %c2_52, %c0_53, %c0_54], %131 {strides = array<i32>} : memref<1x11x8x128xf32, #tpu.memory_space<vmem>>, vector<1x1x8x128xf32>,
    %c0_55 = arith.constant 0 : index
    %c3_56 = arith.constant 3 : index
    %c0_57 = arith.constant 0 : index
    %c0_58 = arith.constant 0 : index
    %132 = vector.load %arg5[%c0_55, %c3_56, %c0_57, %c0_58] : memref<1x11x8x128xf32, #tpu.memory_space<vmem>>, vector<1x1x8x128xf32>
    %133 = vector.shape_cast %132 : vector<1x1x8x128xf32> to vector<8x128xf32>
    %134 = arith.addf %133, %81 : vector<8x128xf32>
    %c0_59 = arith.constant 0 : index
    %c3_60 = arith.constant 3 : index
    %c0_61 = arith.constant 0 : index
    %c0_62 = arith.constant 0 : index
    %135 = vector.load %arg5[%c0_59, %c3_60, %c0_61, %c0_62] : memref<1x11x8x128xf32, #tpu.memory_space<vmem>>, vector<1x1x8x128xf32>
    %136 = vector.shape_cast %135 : vector<1x1x8x128xf32> to vector<8x128xf32>
    %137 = vector.shape_cast %134 : vector<8x128xf32> to vector<1x1x8x128xf32>
    tpu.vector_store %arg5[%c0_59, %c3_60, %c0_61, %c0_62], %137 {strides = array<i32>} : memref<1x11x8x128xf32, #tpu.memory_space<vmem>>, vector<1x1x8x128xf32>,
    %c0_63 = arith.constant 0 : index
    %c4_64 = arith.constant 4 : index
    %c0_65 = arith.constant 0 : index
    %c0_66 = arith.constant 0 : index
    %138 = vector.load %arg5[%c0_63, %c4_64, %c0_65, %c0_66] : memref<1x11x8x128xf32, #tpu.memory_space<vmem>>, vector<1x1x8x128xf32>
    %139 = vector.shape_cast %138 : vector<1x1x8x128xf32> to vector<8x128xf32>
    %140 = arith.addf %139, %94 : vector<8x128xf32>
    %c0_67 = arith.constant 0 : index
    %c4_68 = arith.constant 4 : index
    %c0_69 = arith.constant 0 : index
    %c0_70 = arith.constant 0 : index
    %141 = vector.load %arg5[%c0_67, %c4_68, %c0_69, %c0_70] : memref<1x11x8x128xf32, #tpu.memory_space<vmem>>, vector<1x1x8x128xf32>
    %142 = vector.shape_cast %141 : vector<1x1x8x128xf32> to vector<8x128xf32>
    %143 = vector.shape_cast %140 : vector<8x128xf32> to vector<1x1x8x128xf32>
    tpu.vector_store %arg5[%c0_67, %c4_68, %c0_69, %c0_70], %143 {strides = array<i32>} : memref<1x11x8x128xf32, #tpu.memory_space<vmem>>, vector<1x1x8x128xf32>,
    %c0_71 = arith.constant 0 : index
    %c5_72 = arith.constant 5 : index
    %c0_73 = arith.constant 0 : index
    %c0_74 = arith.constant 0 : index
    %144 = vector.load %arg5[%c0_71, %c5_72, %c0_73, %c0_74] : memref<1x11x8x128xf32, #tpu.memory_space<vmem>>, vector<1x1x8x128xf32>
    %145 = vector.shape_cast %144 : vector<1x1x8x128xf32> to vector<8x128xf32>
    %146 = arith.addf %145, %107 : vector<8x128xf32>
    %c0_75 = arith.constant 0 : index
    %c5_76 = arith.constant 5 : index
    %c0_77 = arith.constant 0 : index
    %c0_78 = arith.constant 0 : index
    %147 = vector.load %arg5[%c0_75, %c5_76, %c0_77, %c0_78] : memref<1x11x8x128xf32, #tpu.memory_space<vmem>>, vector<1x1x8x128xf32>
    %148 = vector.shape_cast %147 : vector<1x1x8x128xf32> to vector<8x128xf32>
    %149 = vector.shape_cast %146 : vector<8x128xf32> to vector<1x1x8x128xf32>
    tpu.vector_store %arg5[%c0_75, %c5_76, %c0_77, %c0_78], %149 {strides = array<i32>} : memref<1x11x8x128xf32, #tpu.memory_space<vmem>>, vector<1x1x8x128xf32>,
    %c0_79 = arith.constant 0 : index
    %c6 = arith.constant 6 : index
    %c0_80 = arith.constant 0 : index
    %c0_81 = arith.constant 0 : index
    %150 = vector.load %arg5[%c0_79, %c6, %c0_80, %c0_81] : memref<1x11x8x128xf32, #tpu.memory_space<vmem>>, vector<1x1x8x128xf32>
    %151 = vector.shape_cast %150 : vector<1x1x8x128xf32> to vector<8x128xf32>
    %152 = arith.addf %151, %61 : vector<8x128xf32>
    %c0_82 = arith.constant 0 : index
    %c6_83 = arith.constant 6 : index
    %c0_84 = arith.constant 0 : index
    %c0_85 = arith.constant 0 : index
    %153 = vector.load %arg5[%c0_82, %c6_83, %c0_84, %c0_85] : memref<1x11x8x128xf32, #tpu.memory_space<vmem>>, vector<1x1x8x128xf32>
    %154 = vector.shape_cast %153 : vector<1x1x8x128xf32> to vector<8x128xf32>
    %155 = vector.shape_cast %152 : vector<8x128xf32> to vector<1x1x8x128xf32>
    tpu.vector_store %arg5[%c0_82, %c6_83, %c0_84, %c0_85], %155 {strides = array<i32>} : memref<1x11x8x128xf32, #tpu.memory_space<vmem>>, vector<1x1x8x128xf32>,
    %c0_86 = arith.constant 0 : index
    %c7 = arith.constant 7 : index
    %c0_87 = arith.constant 0 : index
    %c0_88 = arith.constant 0 : index
    %156 = vector.load %arg5[%c0_86, %c7, %c0_87, %c0_88] : memref<1x11x8x128xf32, #tpu.memory_space<vmem>>, vector<1x1x8x128xf32>
    %157 = vector.shape_cast %156 : vector<1x1x8x128xf32> to vector<8x128xf32>
    %158 = arith.addf %157, %74 : vector<8x128xf32>
    %c0_89 = arith.constant 0 : index
    %c7_90 = arith.constant 7 : index
    %c0_91 = arith.constant 0 : index
    %c0_92 = arith.constant 0 : index
    %159 = vector.load %arg5[%c0_89, %c7_90, %c0_91, %c0_92] : memref<1x11x8x128xf32, #tpu.memory_space<vmem>>, vector<1x1x8x128xf32>
    %160 = vector.shape_cast %159 : vector<1x1x8x128xf32> to vector<8x128xf32>
    %161 = vector.shape_cast %158 : vector<8x128xf32> to vector<1x1x8x128xf32>
    tpu.vector_store %arg5[%c0_89, %c7_90, %c0_91, %c0_92], %161 {strides = array<i32>} : memref<1x11x8x128xf32, #tpu.memory_space<vmem>>, vector<1x1x8x128xf32>,
    %c0_93 = arith.constant 0 : index
    %c8 = arith.constant 8 : index
    %c0_94 = arith.constant 0 : index
    %c0_95 = arith.constant 0 : index
    %162 = vector.load %arg5[%c0_93, %c8, %c0_94, %c0_95] : memref<1x11x8x128xf32, #tpu.memory_space<vmem>>, vector<1x1x8x128xf32>
    %163 = vector.shape_cast %162 : vector<1x1x8x128xf32> to vector<8x128xf32>
    %164 = arith.addf %163, %87 : vector<8x128xf32>
    %c0_96 = arith.constant 0 : index
    %c8_97 = arith.constant 8 : index
    %c0_98 = arith.constant 0 : index
    %c0_99 = arith.constant 0 : index
    %165 = vector.load %arg5[%c0_96, %c8_97, %c0_98, %c0_99] : memref<1x11x8x128xf32, #tpu.memory_space<vmem>>, vector<1x1x8x128xf32>
    %166 = vector.shape_cast %165 : vector<1x1x8x128xf32> to vector<8x128xf32>
    %167 = vector.shape_cast %164 : vector<8x128xf32> to vector<1x1x8x128xf32>
    tpu.vector_store %arg5[%c0_96, %c8_97, %c0_98, %c0_99], %167 {strides = array<i32>} : memref<1x11x8x128xf32, #tpu.memory_space<vmem>>, vector<1x1x8x128xf32>,
    %c0_100 = arith.constant 0 : index
    %c9 = arith.constant 9 : index
    %c0_101 = arith.constant 0 : index
    %c0_102 = arith.constant 0 : index
    %168 = vector.load %arg5[%c0_100, %c9, %c0_101, %c0_102] : memref<1x11x8x128xf32, #tpu.memory_space<vmem>>, vector<1x1x8x128xf32>
    %169 = vector.shape_cast %168 : vector<1x1x8x128xf32> to vector<8x128xf32>
    %170 = arith.addf %169, %100 : vector<8x128xf32>
    %c0_103 = arith.constant 0 : index
    %c9_104 = arith.constant 9 : index
    %c0_105 = arith.constant 0 : index
    %c0_106 = arith.constant 0 : index
    %171 = vector.load %arg5[%c0_103, %c9_104, %c0_105, %c0_106] : memref<1x11x8x128xf32, #tpu.memory_space<vmem>>, vector<1x1x8x128xf32>
    %172 = vector.shape_cast %171 : vector<1x1x8x128xf32> to vector<8x128xf32>
    %173 = vector.shape_cast %170 : vector<8x128xf32> to vector<1x1x8x128xf32>
    tpu.vector_store %arg5[%c0_103, %c9_104, %c0_105, %c0_106], %173 {strides = array<i32>} : memref<1x11x8x128xf32, #tpu.memory_space<vmem>>, vector<1x1x8x128xf32>,
    %c0_107 = arith.constant 0 : index
    %c10 = arith.constant 10 : index
    %c0_108 = arith.constant 0 : index
    %c0_109 = arith.constant 0 : index
    %174 = vector.load %arg5[%c0_107, %c10, %c0_108, %c0_109] : memref<1x11x8x128xf32, #tpu.memory_space<vmem>>, vector<1x1x8x128xf32>
    %175 = vector.shape_cast %174 : vector<1x1x8x128xf32> to vector<8x128xf32>
    %176 = arith.addf %175, %113 : vector<8x128xf32>
    %c0_110 = arith.constant 0 : index
    %c10_111 = arith.constant 10 : index
    %c0_112 = arith.constant 0 : index
    %c0_113 = arith.constant 0 : index
    %177 = vector.load %arg5[%c0_110, %c10_111, %c0_112, %c0_113] : memref<1x11x8x128xf32, #tpu.memory_space<vmem>>, vector<1x1x8x128xf32>
    %178 = vector.shape_cast %177 : vector<1x1x8x128xf32> to vector<8x128xf32>
    %179 = vector.shape_cast %176 : vector<8x128xf32> to vector<1x1x8x128xf32>
    tpu.vector_store %arg5[%c0_110, %c10_111, %c0_112, %c0_113], %179 {strides = array<i32>} : memref<1x11x8x128xf32, #tpu.memory_space<vmem>>, vector<1x1x8x128xf32>,
    return
  }
  func.func @transform_0(%arg0: i32, %arg1: i32) -> i32 {
    %c0_i32 = arith.constant 0 : i32
    %c0_i32_0 = arith.constant 0 : i32
    return %c0_i32 : i32
  }
  func.func @transform_1(%arg0: i32, %arg1: i32) -> (i32, i32) {
    %c1_i32 = arith.constant 1 : i32
    %0 = arith.muli %arg0, %c1_i32 : i32
    %1 = arith.addi %0, %arg1 : i32
    %c0_i32 = arith.constant 0 : i32
    %2 = arith.minsi %1, %c0_i32 : i32
    %c0_i32_0 = arith.constant 0 : i32
    %c0_i32_1 = arith.constant 0 : i32
    return %2, %c0_i32_0 : i32, i32
  }
  func.func @transform_2(%arg0: i32, %arg1: i32) -> (i32, i32) {
    %c1_i32 = arith.constant 1 : i32
    %0 = arith.muli %arg0, %c1_i32 : i32
    %1 = arith.addi %0, %arg1 : i32
    %c0_i32 = arith.constant 0 : i32
    %2 = arith.minsi %1, %c0_i32 : i32
    %c0_i32_0 = arith.constant 0 : i32
    %c0_i32_1 = arith.constant 0 : i32
    return %2, %c0_i32_0 : i32, i32
  }
  func.func @transform_3(%arg0: i32, %arg1: i32) -> (i32, i32, i32, i32) {
    %c0_i32 = arith.constant 0 : i32
    %c0_i32_0 = arith.constant 0 : i32
    %c0_i32_1 = arith.constant 0 : i32
    %c0_i32_2 = arith.constant 0 : i32
    return %arg0, %c0_i32, %c0_i32_0, %c0_i32_1 : i32, i32, i32, i32
  }
}

</mosaic_0001>

<bundles_post_ra>
// kernel: tpu_custom_call.1
= control target key start
LH: loop header
LB: loop body
LE: loop exit
PB: predicated region body
PF: predicated region fallthrough
CT: control target
= control target key end

     0   :  { %8 = vsyncpa [#allocation5], 0  ;;  %s485_s0 = inlined_call_operand.hbm [shape: f32[6], index: 0, kind: input, shape index: {}]   ;;  %s486_s1 = inlined_call_operand.hbm [shape: f32[16,128], index: 1, kind: input, shape index: {}]   ;;  %s487_s2 = inlined_call_operand.hbm [shape: f32[16,128], index: 2, kind: input, shape index: {}]   ;;  %s488_s3 = inlined_call_operand.hbm [shape: f32[1,11,8,128], index: 3, kind: output, shape index: {}]  }
   0x1   :  { %9 = vsyncpa [#allocation3], 0 }
   0x2   :  { %10 = vsyncpa [#allocation8], 0 }
   0x3   :  { %11 = vsyncpa [#allocation4], 0  ;;  %s17_s14 = sshll.u32 %s485_s0, 4  ;;  %s31_s17 = sshll.u32 %s486_s1, 4  ;;  %s18_s14 = int_to_ptr.hbm [resolvable:$true] %s17_s14  ;;  %s32_s17 = int_to_ptr.hbm [resolvable:$true] %s31_s17 }
   0x4   :  { %s357_s18 = smov [#allocation2]   ;;  %s358_s19 = smov [#allocation6]  }
   0x5   :  { %20 = dma.hbm_to_smem %s18_s14, 16, %s357_s18, [#allocation5]  }
   0x6   :  { %s33_s20 = sshll.u32 %s358_s19, 4  ;;  %s359_s21 = smov 128   ;;  %s34_s20 = int_to_ptr.vmem [resolvable:$true] %s33_s20 }
   0x7   :  { %s360_s22 = smov 8   ;;  %s50_s0 = sshll.u32 %s487_s2, 4  ;;  %s51_s0 = int_to_ptr.hbm [resolvable:$true] %s50_s0 }
   0x8   :  { %39 = dma.hbm_to_vmem [thread:$0]  %s32_s17, 256, %s34_s20, [#allocation3], %s359_s21, %s359_s21, %s360_s22  }
   0x9   :  { %s361_s25 = smov [#allocation7]  }
   0xa   :  { %s52_s26 = sshll.u32 %s361_s25, 4  ;;  %s53_s26 = int_to_ptr.vmem [resolvable:$true] %s52_s26 }
   0xb   :  { %58 = dma.hbm_to_vmem [thread:$0]  %s51_s0, 256, %s53_s26, [#allocation8], %s359_s21, %s359_s21, %s360_s22  }
   0xc   :  { %349 = dma.done.wait [#allocation5], 16  }
   0xd   :  { %350 = vsyncadd [#allocation5], 4294967280 }
   0xe   :  { %351 = dma.done.wait [#allocation3], 256  }
   0xf   :  { %352 = vsyncadd [#allocation3], 4294967040 }
  0x10   :  { %353 = dma.done.wait [#allocation8], 256  }
  0x11   :  { %354 = vsyncadd [#allocation8], 4294967040 }
  0x12   :  { %71 = sfence }
  0x13   :  { %v111_v0 = vld [vmem:[#allocation6] sm:$0xff]  ;;  %v112_v1 = vld [vmem:[#allocation6 + $0x8] sm:$0xff]  ;;  %v113_v2 = vld [vmem:[#allocation7] sm:$0xff]  ;;  %s253_s1 = sld [smem:[#allocation2 + $0x1]]  ;;  %v362_v38 = vmov 0.0   ;;  %s363_s30 = smov [#allocation9]  }
  0x14   :  { %v114_v3 = vld [vmem:[#allocation7 + $0x8] sm:$0xff]  ;;  %v115_v4 = vsub.f32 %v111_v0, %v113_v2  ;;  %s254_s2 = sld [smem:[#allocation2 + $0x2]]  ;;  %s232_s4 = sshll.u32 %s363_s30, 4  ;;  %s233_s4 = int_to_ptr.vmem [resolvable:$true] %s232_s4 }
  0x15   :  { %v116_v5 = vsub.f32 %v112_v1, %v114_v3  ;;  %s255_s27 = sld [smem:[#allocation2 + $0x3]]  ;;  %s234_s7 = sshll.u32 %s488_s3, 4  ;;  %s235_s7 = int_to_ptr.hbm [resolvable:$true] %s234_s7 }
  0x16   :  { %v117_v6 = vmul.f32 %v115_v4, %v115_v4  ;;  %s256_s28 = sld [smem:[#allocation2 + $0x4]] }
  0x17   :  { %v118_v7 = vmul.f32 %v116_v5, %v116_v5  ;;  %s257_s29 = sld [smem:[#allocation2 + $0x5]] }
  0x19   :  { %v128_v8 = vadd.f32 %v118_v7, %v117_v6  ;;  %v130_v9 = vstv %s253_s1 }
  0x1a   :  { %vm399_vm0 = vcmp.ge.f32.partialorder %v113_v2, %v130_v9  ;;  %vm403_vm1 = vcmp.ge.f32.partialorder %v114_v3, %v130_v9  ;;  %v141_v12 = vstv %s254_s2 }
  0x1b   :  { %v133_v13 = vsel %vm399_vm0, %v117_v6, 0.0  ;;  %v134_v14 = vsel %vm403_vm1, %v118_v7, 0.0  ;;  %vm411_vm2 = vcmp.ge.f32.partialorder %v113_v2, %v141_v12  ;;  %vm415_vm3 = vcmp.ge.f32.partialorder %v114_v3, %v141_v12  ;;  %187 = vst [vmem:[#allocation9] sm:$0xff] %v128_v8 }
  0x1c   :  { %v135_v16 = vadd.f32 %v134_v14, %v133_v13  ;;  %v144_v18 = vsel %vm411_vm2, %v117_v6, 0.0  ;;  %v152_v19 = vstv %s255_s27  ;;  %v145_v20 = vsel %vm415_vm3, %v118_v7, 0.0 }
  0x1d   :  { %vm423_vm4 = vcmp.ge.f32.partialorder %v113_v2, %v152_v19  ;;  %vm427_vm5 = vcmp.ge.f32.partialorder %v114_v3, %v152_v19  ;;  %v163_v23 = vstv %s256_s28  ;;  %v146_v24 = vadd.f32 %v145_v20, %v144_v18 }
  0x1e   :  { %v155_v25 = vsel %vm423_vm4, %v117_v6, 0.0  ;;  %v156_v26 = vsel %vm427_vm5, %v118_v7, 0.0  ;;  %vm435_vm6 = vcmp.ge.f32.partialorder %v113_v2, %v163_v23  ;;  %vm439_vm7 = vcmp.ge.f32.partialorder %v114_v3, %v163_v23  ;;  %191 = vst [vmem:[#allocation9 + $0x8] sm:$0xff] %v135_v16 }
  0x1f   :  { %v157_v27 = vadd.f32 %v156_v26, %v155_v25  ;;  %v174_v30 = vstv %s257_s29  ;;  %v166_v31 = vsel %vm435_vm6, %v117_v6, 0.0  ;;  %v167_v32 = vsel %vm439_vm7, %v118_v7, 0.0  ;;  %195 = vst [vmem:[#allocation9 + $0x10] sm:$0xff] %v146_v24 }
  0x20   :  { %vm447_vm8 = vcmp.ge.f32.partialorder %v113_v2, %v174_v30  ;;  %v168_v34 = vadd.f32 %v167_v32, %v166_v31  ;;  %vm451_vm9 = vcmp.ge.f32.partialorder %v114_v3, %v174_v30  ;;  %v137_v39 = vsel %vm399_vm0, 1.0, %v362_v38 }
  0x21   :  { %v177_v36 = vsel %vm447_vm8, %v117_v6, 0.0  ;;  %v178_v37 = vsel %vm451_vm9, %v118_v7, 0.0  ;;  %v138_v40 = vsel %vm403_vm1, 1.0, %v362_v38  ;;  %v148_v41 = vsel %vm411_vm2, 1.0, %v362_v38  ;;  %199 = vst [vmem:[#allocation9 + $0x18] sm:$0xff] %v157_v27 }
  0x22   :  { %v179_v42 = vadd.f32 %v178_v37, %v177_v36  ;;  %v139_v43 = vadd.f32 %v138_v40, %v137_v39  ;;  %v149_v44 = vsel %vm415_vm3, 1.0, %v362_v38  ;;  %v159_v46 = vsel %vm423_vm4, 1.0, %v362_v38  ;;  %203 = vst [vmem:[#allocation9 + $0x20] sm:$0xff] %v168_v34 }
  0x23   :  { %v150_v45 = vadd.f32 %v149_v44, %v148_v41  ;;  %v160_v47 = vsel %vm427_vm5, 1.0, %v362_v38  ;;  %v170_v48 = vsel %vm435_vm6, 1.0, %v362_v38  ;;  %v171_v50 = vsel %vm439_vm7, 1.0, %v362_v38 }
  0x24   :  { %v161_v49 = vadd.f32 %v160_v47, %v159_v46  ;;  %v172_v51 = vadd.f32 %v171_v50, %v170_v48  ;;  %v181_v52 = vsel %vm447_vm8, 1.0, %v362_v38  ;;  %v182_v53 = vsel %vm451_vm9, 1.0, %v362_v38  ;;  %207 = vst [vmem:[#allocation9 + $0x28] sm:$0xff] %v179_v42 }
  0x25   :  { %v183_v54 = vadd.f32 %v182_v53, %v181_v52  ;;  %211 = vst [vmem:[#allocation9 + $0x30] sm:$0xff] %v139_v43 }
  0x26   :  { %215 = vst [vmem:[#allocation9 + $0x38] sm:$0xff] %v150_v45 }
  0x27   :  { %219 = vst [vmem:[#allocation9 + $0x40] sm:$0xff] %v161_v49 }
  0x28   :  { %223 = vst [vmem:[#allocation9 + $0x48] sm:$0xff] %v172_v51 }
  0x29   :  { %227 = vst [vmem:[#allocation9 + $0x50] sm:$0xff] %v183_v54 }
  0x2a   :  { %240 = dma.vmem_to_hbm [thread:$0]  %s233_s4, 1408, %s235_s7, [#allocation4], %s359_s21, %s359_s21, %s360_s22  }
  0x2b   :  { %355 = dma.done.wait [#allocation4], 1408  }
  0x2c   :  { %356 = vsyncadd [#allocation4], 4294965888 }
  0x2d   :  { %245 = vsyncpa [#allocation3], 1 }
  0x2e   :  { %246 = vsyncpa [#allocation8], 1 }
  0x2f   :  { %247 = vsyncpa [#allocation4], 1 }
  0x30   :  { %248 = vsyncpa [#allocation5], 1 }

</bundles_post_ra>
